<compile_context>
chip_gen: v5e
topology: v5e:2x2
jax: 0.10.0
libtpu: 0.0.40
codegen_flags: <defaults>
</compile_context>

<pallas_src>
import numpy as np
import jax
import jax.numpy as jnp
from jax.experimental import pallas as pl
from jax.experimental.pallas import tpu as pltpu

EPS = 1e-5  # nn.GroupNorm default eps


# ----------------------------- constant builders ------------------------------
def _col_shift(W, j):
    """S[w', w] = 1 iff w' == w + j - 1 (3x3 conv, pad 1, horizontal tap j)."""
    wp = np.arange(W)[:, None]
    w = np.arange(W)[None, :]
    return (wp == w + (j - 1)).astype(np.float32)


def _col_gather_stride2(W, j):
    """G[w', c'] = 1 iff w' == 2*c' - 1 + j (4x4 conv, stride 2, pad 1)."""
    g = np.zeros((W, W // 2), np.float32)
    for cp in range(W // 2):
        wp = 2 * cp - 1 + j
        if 0 <= wp < W:
            g[wp, cp] = 1.0
    return g


def _tile_channels(v, reps):
    return np.tile(np.asarray(v, np.float32).reshape(-1), reps)[None, :]


def prepare_block(params, H, W):
    """Precompute (once) the structured weight matrices consumed by the kernel."""
    Cin = params["w1"].shape[0] // 9
    Cout = params["w1"].shape[1]
    assert H % 8 == 0 and W % 2 == 0

    w1 = np.asarray(params["w1"], np.float32).reshape(3, 3, Cin, Cout)
    w2 = np.asarray(params["w2"], np.float32).reshape(3, 3, Cout, Cout)
    wtr = np.asarray(params["wtr"], np.float32).reshape(4, 4, Cout, Cout)

    # 3x3 convs: pre-sum horizontal taps j, stack vertical taps i along K.
    scol = [_col_shift(W, j) for j in range(3)]
    w1s = np.concatenate(
        [sum(np.kron(scol[j], w1[i, j]) for j in range(3)) for i in range(3)],
        axis=0)                                           # (3*W*Cin,  W*Cout)
    w2s = np.concatenate(
        [sum(np.kron(scol[j], w2[i, j]) for j in range(3)) for i in range(3)],
        axis=0)                                           # (3*W*Cout, W*Cout)

    # 4x4 stride-2 transform: fold horizontal gather + stride into the weight,
    # stack the 4 vertical taps along K.
    gcol = [_col_gather_stride2(W, j) for j in range(4)]
    wtrs = np.concatenate(
        [sum(np.kron(gcol[j], wtr[i, j]) for j in range(4)) for i in range(4)],
        axis=0)                                           # (4*W*Cout, (W//2)*Cout)

    aff1 = np.concatenate([_tile_channels(params["b1"], W),
                           _tile_channels(params["g1"], W),
                           _tile_channels(params["be1"], W)], axis=0)   # (3, W*Cout)
    aff2 = np.concatenate([_tile_channels(params["b2"], W),
                           _tile_channels(params["g2"], W),
                           _tile_channels(params["be2"], W)], axis=0)   # (3, W*Cout)
    btr_t = _tile_channels(params["btr"], W // 2)                        # (1, (W//2)*Cout)

    return dict(
        w1s=jnp.asarray(w1s, jnp.bfloat16),
        w2s=jnp.asarray(w2s, jnp.bfloat16),
        wtrs=jnp.asarray(wtrs, jnp.bfloat16),
        aff1=jnp.asarray(aff1, jnp.float32),
        aff2=jnp.asarray(aff2, jnp.float32),
        btr_t=jnp.asarray(btr_t, jnp.float32),
        wt=jnp.asarray(params["wt"], jnp.float32),
        bt=jnp.asarray(params["bt"], jnp.float32).reshape(1, -1),
        cout=Cout)


# ----------------------------- fused Pallas kernel -----------------------------
def _block_kernel(x_ref, temb_ref, w1_ref, w2_ref, wtr_ref,
                  aff1_ref, aff2_ref, btr_ref, o_ref, scr_ref):
    Nb, H, WCin = x_ref.shape
    WC = scr_ref.shape[2]        # W * Cout
    Hh = o_ref.shape[1]          # H // 2
    WCo2 = o_ref.shape[2]        # (W // 2) * Cout
    inv_n = 1.0 / (H * WC)

    def _sum_hw(a):              # (Nb, H, WC) -> (Nb, 1, 1) per-sample sum
        return jnp.sum(jnp.sum(a, axis=2, keepdims=True), axis=1, keepdims=True)

    def gnorm(a):                # GroupNorm(1 group), one-pass stats, f32
        mean = _sum_hw(a) * inv_n
        var = _sum_hw(a * a) * inv_n - mean * mean
        return (a - mean) * jax.lax.rsqrt(jnp.maximum(var, 0.0) + EPS)

    # Zero-padding rows of the scratch: row 0 <-> input row -1, row H+1 <-> row H.
    zrow = jnp.zeros((Nb, 1, WC), jnp.float32)
    scr_ref[:, 0:1, :] = zrow
    scr_ref[:, H + 1:H + 2, :] = zrow

    def conv3x3(h, c, w_ref):
        """3x3 'same' conv as ONE bf16 MXU matmul.  h: (Nb, H, c) activations,
        w_ref: (3*c, WC) vertical-tap-stacked / horizontal-tap-pre-summed weights."""
        scr_ref[:, 1:H + 1, 0:c] = h
        taps = jnp.concatenate(
            [scr_ref[:, 0:H, 0:c],          # row r-1 (zero at r=0)
             scr_ref[:, 1:H + 1, 0:c],      # row r
             scr_ref[:, 2:H + 2, 0:c]],     # row r+1 (zero at r=H-1)
            axis=2).reshape(Nb * H, 3 * c)
        y = jnp.dot(taps.astype(jnp.bfloat16), w_ref[...],
                    preferred_element_type=jnp.float32)
        return y.reshape(Nb, H, WC)

    # ---- conv1 (3x3, pad 1) + bias + ReLU + GroupNorm(1) + affine + temb ------
    a = conv3x3(x_ref[...], WCin, w1_ref)
    a = jnp.maximum(a + aff1_ref[0:1, :], 0.0)
    h1 = gnorm(a) * aff1_ref[1:2, :] + aff1_ref[2:3, :] + temb_ref[...]

    # ---- conv2 (3x3, pad 1) + bias + ReLU + GroupNorm(1) + affine -------------
    b = conv3x3(h1, WC, w2_ref)
    b = jnp.maximum(b + aff2_ref[0:1, :], 0.0)
    h2 = gnorm(b) * aff2_ref[1:2, :] + aff2_ref[2:3, :]

    # ---- transform: Conv2d(out_ch, out_ch, 4, stride=2, padding=1) ------------
    # Output row p needs input rows 2p-1..2p+2 -> scratch rows 2p..2p+3:
    # four stride-2 row gathers (off the MXU), one bf16 matmul.
    scr_ref[:, 1:H + 1, :] = h2
    taps = jnp.concatenate(
        [scr_ref[:, pl.ds(i, Hh, stride=2), :] for i in range(4)],
        axis=2).reshape(Nb * Hh, 4 * WC)
    o = jnp.dot(taps.astype(jnp.bfloat16), wtr_ref[...],
                preferred_element_type=jnp.float32).reshape(Nb, Hh, WCo2)
    o_ref[...] = o + btr_ref[...]


# ----------------------------- forward pass -----------------------------------
def _pick_samples_per_step(n, target=8):
    """Largest divisor of n that is <= target while keeping >= 2 grid steps
    when possible (both v7x TensorCores stay busy via the parallel grid)."""
    cap = min(target, max(1, n // 2))
    for nb in range(cap, 0, -1):
        if n % nb == 0:
            return nb
    return 1


def block_forward(x_nchw, t, prep, samples_per_step=None):
    """Block.forward for up=False. x: (N, Cin, H, W) NCHW, t: (N, time_emb_dim)."""
    N, Cin, H, W = x_nchw.shape
    Cout = prep["cout"]
    WC, WCin, WCo2 = W * Cout, W * Cin, (W // 2) * Cout
    nb = samples_per_step or _pick_samples_per_step(N)
    assert N % nb == 0

    # NCHW -> per-sample lane-dense "rowflat" (H, W*Cin) layout.
    # TODO(synk): when chaining Blocks, keep activations in this rowflat layout
    # between blocks and skip the NCHW<->rowflat transposes.
    x_rf = jnp.transpose(x_nchw, (0, 2, 3, 1)).reshape(N, H, WCin).astype(jnp.float32)
    # Hoisted time-embedding MLP (one batched XLA matmul for all samples).
    temb = jax.nn.relu(t.astype(jnp.float32) @ prep["wt"] + prep["bt"])     # (N, Cout)
    temb_t = jnp.tile(temb, (1, W))[:, None, :]                             # (N, 1, WC)

    flops = (2 * N * H * (3 * WCin + 3 * WC) * WC
             + 2 * N * (H // 2) * (4 * WC) * WCo2)
    bytes_accessed = (4 * (x_rf.size + temb_t.size + N * (H // 2) * WCo2
                           + prep["aff1"].size + prep["aff2"].size + prep["btr_t"].size)
                      + 2 * (prep["w1s"].size + prep["w2s"].size + prep["wtrs"].size))

    out = pl.pallas_call(
        _block_kernel,
        out_shape=jax.ShapeDtypeStruct((N, H // 2, WCo2), jnp.float32),
        grid=(N // nb,),
        in_specs=[
            pl.BlockSpec((nb, H, WCin), lambda g: (g, 0, 0)),
            pl.BlockSpec((nb, 1, WC), lambda g: (g, 0, 0)),
            pl.BlockSpec(prep["w1s"].shape, lambda g: (0, 0)),
            pl.BlockSpec(prep["w2s"].shape, lambda g: (0, 0)),
            pl.BlockSpec(prep["wtrs"].shape, lambda g: (0, 0)),
            pl.BlockSpec(prep["aff1"].shape, lambda g: (0, 0)),
            pl.BlockSpec(prep["aff2"].shape, lambda g: (0, 0)),
            pl.BlockSpec(prep["btr_t"].shape, lambda g: (0, 0)),
        ],
        out_specs=pl.BlockSpec((nb, H // 2, WCo2), lambda g: (g, 0, 0)),
        scratch_shapes=[pltpu.VMEM((nb, H + 2, WC), jnp.float32)],
        compiler_params=pltpu.CompilerParams(dimension_semantics=("parallel",)),
        cost_estimate=pl.CostEstimate(flops=int(flops), transcendentals=4 * N,
                                      bytes_accessed=int(bytes_accessed)),
    )(x_rf, temb_t, prep["w1s"], prep["w2s"], prep["wtrs"],
      prep["aff1"], prep["aff2"], prep["btr_t"])

    # (N, H/2, (W/2)*Cout) -> (N, H/2, W/2, Cout) NHWC (row-major reshape) -> NCHW
    out = out.reshape(N, H // 2, W // 2, Cout)
    return jnp.transpose(out, (0, 3, 1, 2))


# ----------------------------- pure-JAX reference ------------------------------
def _ref_forward(x_nchw, t, params, Cin, Cout):
    x = jnp.transpose(x_nchw, (0, 2, 3, 1))

    def conv(inp, wflat, b, k, stride, pad, cin):
        w = wflat.reshape(k, k, cin, -1)
        y = jax.lax.conv_general_dilated(
            inp, w, (stride, stride), [(pad, pad), (pad, pad)],
            dimension_numbers=("NHWC", "HWIO", "NHWC"))
        return y + b.reshape(1, 1, 1, -1)

    def gn(h, g, be):
        m = jnp.mean(h, axis=(1, 2, 3), keepdims=True)
        v = jnp.mean((h - m) ** 2, axis=(1, 2, 3), keepdims=True)
        return (h - m) * jax.lax.rsqrt(v + EPS) * g.reshape(1, 1, 1, -1) \
               + be.reshape(1, 1, 1, -1)

    h = gn(jax.nn.relu(conv(x, params["w1"], params["b1"], 3, 1, 1, Cin)),
           params["g1"], params["be1"])
    te = jax.nn.relu(t @ params["wt"] + params["bt"])
    h = h + te[:, None, None, :]
    h = gn(jax.nn.relu(conv(h, params["w2"], params["b2"], 3, 1, 1, Cout)),
           params["g2"], params["be2"])
    out = conv(h, params["wtr"], params["btr"], 4, 2, 1, Cout)
    return jnp.transpose(out, (0, 3, 1, 2))


# ----------------------------- main --------------------------------------------
if __name__ == "__main__":
    N, Cin, Cout, H, W, Temb = 2, 4, 8, 16, 16, 32
    key = jax.random.PRNGKey(0)
    ks = jax.random.split(key, 10)

    params = {
        # conv weights stored flattened (kh, kw, cin, cout) -> (kh*kw*cin, cout)
        "w1": (jax.random.normal(ks[0], (3, 3, Cin, Cout)) * 0.1).reshape(9 * Cin, Cout),
        "b1": jax.random.normal(ks[1], (1, Cout)) * 0.1,
        "g1": jnp.ones((1, Cout), jnp.float32),
        "be1": jnp.zeros((1, Cout), jnp.float32),
        "wt": jax.random.normal(ks[2], (Temb, Cout)) * 0.1,
        "bt": jax.random.normal(ks[3], (1, Cout)) * 0.1,
        "w2": (jax.random.normal(ks[4], (3, 3, Cout, Cout)) * 0.1).reshape(9 * Cout, Cout),
        "b2": jax.random.normal(ks[5], (1, Cout)) * 0.1,
        "g2": jnp.ones((1, Cout), jnp.float32),
        "be2": jnp.zeros((1, Cout), jnp.float32),
        "wtr": (jax.random.normal(ks[6], (4, 4, Cout, Cout)) * 0.1).reshape(16 * Cout, Cout),
        "btr": jax.random.normal(ks[7], (1, Cout)) * 0.1,
    }
    x = jax.random.normal(ks[8], (N, Cin, H, W), jnp.float32)
    t = jax.random.normal(ks[9], (N, Temb), jnp.float32)

    prep = prepare_block(params, H, W)        # one-time structured-weight build
    fwd = jax.jit(lambda xx, tt: block_forward(xx, tt, prep))

    out = jax.block_until_ready(fwd(x, t))
    assert out.shape == (N, Cout, H // 2, W // 2), out.shape

    ref = _ref_forward(x, t, params, Cin, Cout)
    # bf16 MXU operands vs. f32 reference -> bf16-appropriate tolerance.
    assert jnp.allclose(out, ref, rtol=5e-2, atol=5e-2), \
        float(jnp.max(jnp.abs(out - ref)))

    print("KERNEL_OK")
</pallas_src>

<mosaic_0001>
module attributes {stable_mosaic.version = 11 : i64} {
  func.func @_block_kernel(%arg0: i32, %arg1: memref<1x16x64xf32, #tpu.memory_space<vmem>>, %arg2: memref<1x1x128xf32, #tpu.memory_space<vmem>>, %arg3: memref<192x128xbf16, #tpu.memory_space<vmem>>, %arg4: memref<384x128xbf16, #tpu.memory_space<vmem>>, %arg5: memref<512x64xbf16, #tpu.memory_space<vmem>>, %arg6: memref<3x128xf32, #tpu.memory_space<vmem>>, %arg7: memref<3x128xf32, #tpu.memory_space<vmem>>, %arg8: memref<1x64xf32, #tpu.memory_space<vmem>>, %arg9: memref<1x8x64xf32, #tpu.memory_space<vmem>>, %arg10: memref<1x18x128xf32, #tpu.memory_space<vmem>>) attributes {dimension_semantics = [#tpu.dimension_semantics<parallel>], iteration_bounds = array<i64: 2>, scalar_prefetch = 0 : i64, scratch_operands = 1 : i64, tpu.core_type = #tpu.core_type<tc>, window_params = [{transform_indices = @transform_0, window_bounds = array<i64: 1, 16, 64>}, {transform_indices = @transform_1, window_bounds = array<i64: 1, 1, 128>}, {pipeline_mode = #tpu.pipeline_mode<synchronous>, transform_indices = @transform_2, window_bounds = array<i64: 192, 128>}, {pipeline_mode = #tpu.pipeline_mode<synchronous>, transform_indices = @transform_3, window_bounds = array<i64: 384, 128>}, {pipeline_mode = #tpu.pipeline_mode<synchronous>, transform_indices = @transform_4, window_bounds = array<i64: 512, 64>}, {pipeline_mode = #tpu.pipeline_mode<synchronous>, transform_indices = @transform_5, window_bounds = array<i64: 3, 128>}, {pipeline_mode = #tpu.pipeline_mode<synchronous>, transform_indices = @transform_6, window_bounds = array<i64: 3, 128>}, {pipeline_mode = #tpu.pipeline_mode<synchronous>, transform_indices = @transform_7, window_bounds = array<i64: 1, 64>}, {transform_indices = @transform_8, window_bounds = array<i64: 1, 8, 64>}]} {
    %cst = arith.constant 0.000000e+00 : f32
    %0 = vector.broadcast %cst : f32 to vector<1x1x128xf32>
    %c0 = arith.constant 0 : index
    %c0_0 = arith.constant 0 : index
    %c0_1 = arith.constant 0 : index
    %1 = vector.load %arg10[%c0, %c0_0, %c0_1] : memref<1x18x128xf32, #tpu.memory_space<vmem>>, vector<1x1x128xf32>
    tpu.vector_store %arg10[%c0, %c0_0, %c0_1], %0 {strides = array<i32>} : memref<1x18x128xf32, #tpu.memory_space<vmem>>, vector<1x1x128xf32>,
    %c0_2 = arith.constant 0 : index
    %c17 = arith.constant 17 : index
    %c0_3 = arith.constant 0 : index
    %2 = vector.load %arg10[%c0_2, %c17, %c0_3] : memref<1x18x128xf32, #tpu.memory_space<vmem>>, vector<1x1x128xf32>
    tpu.vector_store %arg10[%c0_2, %c17, %c0_3], %0 {strides = array<i32>} : memref<1x18x128xf32, #tpu.memory_space<vmem>>, vector<1x1x128xf32>,
    %c0_4 = arith.constant 0 : index
    %c0_5 = arith.constant 0 : index
    %c0_6 = arith.constant 0 : index
    %3 = vector.load %arg1[%c0_4, %c0_5, %c0_6] : memref<1x16x64xf32, #tpu.memory_space<vmem>>, vector<1x16x64xf32>
    %c0_7 = arith.constant 0 : index
    %c1 = arith.constant 1 : index
    %c0_8 = arith.constant 0 : index
    %4 = vector.load %arg10[%c0_7, %c1, %c0_8] : memref<1x18x128xf32, #tpu.memory_space<vmem>>, vector<1x16x64xf32>
    tpu.vector_store %arg10[%c0_7, %c1, %c0_8], %3 {strides = array<i32>} : memref<1x18x128xf32, #tpu.memory_space<vmem>>, vector<1x16x64xf32>,
    %c0_9 = arith.constant 0 : index
    %c0_10 = arith.constant 0 : index
    %c0_11 = arith.constant 0 : index
    %5 = vector.load %arg10[%c0_9, %c0_10, %c0_11] : memref<1x18x128xf32, #tpu.memory_space<vmem>>, vector<1x16x64xf32>
    %c0_12 = arith.constant 0 : index
    %c1_13 = arith.constant 1 : index
    %c0_14 = arith.constant 0 : index
    %6 = vector.load %arg10[%c0_12, %c1_13, %c0_14] : memref<1x18x128xf32, #tpu.memory_space<vmem>>, vector<1x16x64xf32>
    %c0_15 = arith.constant 0 : index
    %c2 = arith.constant 2 : index
    %c0_16 = arith.constant 0 : index
    %7 = vector.load %arg10[%c0_15, %c2, %c0_16] : memref<1x18x128xf32, #tpu.memory_space<vmem>>, vector<1x16x64xf32>
    %8 = tpu.concatenate %5, %6, %7 in 2 : vector<1x16x64xf32>, vector<1x16x64xf32>, vector<1x16x64xf32> -> vector<1x16x192xf32>
    %9 = vector.shape_cast %8 : vector<1x16x192xf32> to vector<16x192xf32>
    %10 = arith.truncf %9 : vector<16x192xf32> to vector<16x192xbf16>
    %c0_17 = arith.constant 0 : index
    %c0_18 = arith.constant 0 : index
    %11 = vector.load %arg3[%c0_17, %c0_18] : memref<192x128xbf16, #tpu.memory_space<vmem>>, vector<192x128xbf16>
    %cst_19 = arith.constant dense<0.000000e+00> : vector<16x128xf32>
    %12 = tpu.matmul %10, %11, %cst_19 {dimension_numbers = #tpu.dot_dimension_numbers<[1], [0], [0], [1], [0, 0, 1, 1], [], []>} : vector<16x192xbf16>, vector<192x128xbf16>, vector<16x128xf32> -> vector<16x128xf32>
    %13 = vector.shape_cast %12 : vector<16x128xf32> to vector<1x16x128xf32>
    %c0_20 = arith.constant 0 : index
    %c0_21 = arith.constant 0 : index
    %14 = vector.load %arg6[%c0_20, %c0_21] : memref<3x128xf32, #tpu.memory_space<vmem>>, vector<1x128xf32>
    %15 = vector.shape_cast %14 : vector<1x128xf32> to vector<1x1x128xf32>
    %16 = vector.broadcast %15 : vector<1x1x128xf32> to vector<1x16x128xf32>
    %17 = arith.addf %13, %16 : vector<1x16x128xf32>
    %cst_22 = arith.constant 0.000000e+00 : f32
    %18 = vector.broadcast %cst_22 : f32 to vector<1x16x128xf32>
    %19 = arith.maximumf %17, %18 : vector<1x16x128xf32>
    %cst_23 = arith.constant dense<0.000000e+00> : vector<1x16xf32>
    %20 = vector.multi_reduction <add>, %19, %cst_23 [2] : vector<1x16x128xf32> to vector<1x16xf32>
    %21 = vector.shape_cast %20 : vector<1x16xf32> to vector<1x16x1xf32>
    %cst_24 = arith.constant dense<0.000000e+00> : vector<1x1xf32>
    %22 = vector.multi_reduction <add>, %21, %cst_24 [1] : vector<1x16x1xf32> to vector<1x1xf32>
    %23 = vector.shape_cast %22 : vector<1x1xf32> to vector<1x1x1xf32>
    %cst_25 = arith.constant 4.8828125E-4 : f32
    %24 = vector.broadcast %cst_25 : f32 to vector<1x1x1xf32>
    %25 = arith.mulf %23, %24 : vector<1x1x1xf32>
    %26 = arith.mulf %19, %19 : vector<1x16x128xf32>
    %cst_26 = arith.constant dense<0.000000e+00> : vector<1x16xf32>
    %27 = vector.multi_reduction <add>, %26, %cst_26 [2] : vector<1x16x128xf32> to vector<1x16xf32>
    %28 = vector.shape_cast %27 : vector<1x16xf32> to vector<1x16x1xf32>
    %cst_27 = arith.constant dense<0.000000e+00> : vector<1x1xf32>
    %29 = vector.multi_reduction <add>, %28, %cst_27 [1] : vector<1x16x1xf32> to vector<1x1xf32>
    %30 = vector.shape_cast %29 : vector<1x1xf32> to vector<1x1x1xf32>
    %cst_28 = arith.constant 4.8828125E-4 : f32
    %31 = vector.broadcast %cst_28 : f32 to vector<1x1x1xf32>
    %32 = arith.mulf %30, %31 : vector<1x1x1xf32>
    %33 = arith.mulf %25, %25 : vector<1x1x1xf32>
    %34 = arith.subf %32, %33 : vector<1x1x1xf32>
    %35 = vector.broadcast %25 : vector<1x1x1xf32> to vector<1x16x128xf32>
    %36 = arith.subf %19, %35 : vector<1x16x128xf32>
    %cst_29 = arith.constant 0.000000e+00 : f32
    %37 = vector.broadcast %cst_29 : f32 to vector<1x1x1xf32>
    %38 = arith.maximumf %34, %37 : vector<1x1x1xf32>
    %cst_30 = arith.constant 9.99999974E-6 : f32
    %39 = vector.broadcast %cst_30 : f32 to vector<1x1x1xf32>
    %40 = arith.addf %38, %39 : vector<1x1x1xf32>
    %41 = math.rsqrt %40 : vector<1x1x1xf32>
    %42 = vector.broadcast %41 : vector<1x1x1xf32> to vector<1x16x128xf32>
    %43 = arith.mulf %36, %42 : vector<1x16x128xf32>
    %c1_31 = arith.constant 1 : index
    %c0_32 = arith.constant 0 : index
    %44 = vector.load %arg6[%c1_31, %c0_32] : memref<3x128xf32, #tpu.memory_space<vmem>>, vector<1x128xf32>
    %45 = vector.shape_cast %44 : vector<1x128xf32> to vector<1x1x128xf32>
    %46 = vector.broadcast %45 : vector<1x1x128xf32> to vector<1x16x128xf32>
    %47 = arith.mulf %43, %46 : vector<1x16x128xf32>
    %c2_33 = arith.constant 2 : index
    %c0_34 = arith.constant 0 : index
    %48 = vector.load %arg6[%c2_33, %c0_34] : memref<3x128xf32, #tpu.memory_space<vmem>>, vector<1x128xf32>
    %49 = vector.shape_cast %48 : vector<1x128xf32> to vector<1x1x128xf32>
    %50 = vector.broadcast %49 : vector<1x1x128xf32> to vector<1x16x128xf32>
    %51 = arith.addf %47, %50 : vector<1x16x128xf32>
    %c0_35 = arith.constant 0 : index
    %c0_36 = arith.constant 0 : index
    %c0_37 = arith.constant 0 : index
    %52 = vector.load %arg2[%c0_35, %c0_36, %c0_37] : memref<1x1x128xf32, #tpu.memory_space<vmem>>, vector<1x1x128xf32>
    %53 = vector.broadcast %52 : vector<1x1x128xf32> to vector<1x16x128xf32>
    %54 = arith.addf %51, %53 : vector<1x16x128xf32>
    %c0_38 = arith.constant 0 : index
    %c1_39 = arith.constant 1 : index
    %c0_40 = arith.constant 0 : index
    %55 = vector.load %arg10[%c0_38, %c1_39, %c0_40] : memref<1x18x128xf32, #tpu.memory_space<vmem>>, vector<1x16x128xf32>
    tpu.vector_store %arg10[%c0_38, %c1_39, %c0_40], %54 {strides = array<i32>} : memref<1x18x128xf32, #tpu.memory_space<vmem>>, vector<1x16x128xf32>,
    %c0_41 = arith.constant 0 : index
    %c0_42 = arith.constant 0 : index
    %c0_43 = arith.constant 0 : index
    %56 = vector.load %arg10[%c0_41, %c0_42, %c0_43] : memref<1x18x128xf32, #tpu.memory_space<vmem>>, vector<1x16x128xf32>
    %c0_44 = arith.constant 0 : index
    %c1_45 = arith.constant 1 : index
    %c0_46 = arith.constant 0 : index
    %57 = vector.load %arg10[%c0_44, %c1_45, %c0_46] : memref<1x18x128xf32, #tpu.memory_space<vmem>>, vector<1x16x128xf32>
    %c0_47 = arith.constant 0 : index
    %c2_48 = arith.constant 2 : index
    %c0_49 = arith.constant 0 : index
    %58 = vector.load %arg10[%c0_47, %c2_48, %c0_49] : memref<1x18x128xf32, #tpu.memory_space<vmem>>, vector<1x16x128xf32>
    %59 = tpu.concatenate %56, %57, %58 in 2 : vector<1x16x128xf32>, vector<1x16x128xf32>, vector<1x16x128xf32> -> vector<1x16x384xf32>
    %60 = vector.shape_cast %59 : vector<1x16x384xf32> to vector<16x384xf32>
    %61 = arith.truncf %60 : vector<16x384xf32> to vector<16x384xbf16>
    %c0_50 = arith.constant 0 : index
    %c0_51 = arith.constant 0 : index
    %62 = vector.load %arg4[%c0_50, %c0_51] : memref<384x128xbf16, #tpu.memory_space<vmem>>, vector<384x128xbf16>
    %cst_52 = arith.constant dense<0.000000e+00> : vector<16x128xf32>
    %63 = tpu.matmul %61, %62, %cst_52 {dimension_numbers = #tpu.dot_dimension_numbers<[1], [0], [0], [1], [0, 0, 1, 1], [], []>} : vector<16x384xbf16>, vector<384x128xbf16>, vector<16x128xf32> -> vector<16x128xf32>
    %64 = vector.shape_cast %63 : vector<16x128xf32> to vector<1x16x128xf32>
    %c0_53 = arith.constant 0 : index
    %c0_54 = arith.constant 0 : index
    %65 = vector.load %arg7[%c0_53, %c0_54] : memref<3x128xf32, #tpu.memory_space<vmem>>, vector<1x128xf32>
    %66 = vector.shape_cast %65 : vector<1x128xf32> to vector<1x1x128xf32>
    %67 = vector.broadcast %66 : vector<1x1x128xf32> to vector<1x16x128xf32>
    %68 = arith.addf %64, %67 : vector<1x16x128xf32>
    %cst_55 = arith.constant 0.000000e+00 : f32
    %69 = vector.broadcast %cst_55 : f32 to vector<1x16x128xf32>
    %70 = arith.maximumf %68, %69 : vector<1x16x128xf32>
    %cst_56 = arith.constant dense<0.000000e+00> : vector<1x16xf32>
    %71 = vector.multi_reduction <add>, %70, %cst_56 [2] : vector<1x16x128xf32> to vector<1x16xf32>
    %72 = vector.shape_cast %71 : vector<1x16xf32> to vector<1x16x1xf32>
    %cst_57 = arith.constant dense<0.000000e+00> : vector<1x1xf32>
    %73 = vector.multi_reduction <add>, %72, %cst_57 [1] : vector<1x16x1xf32> to vector<1x1xf32>
    %74 = vector.shape_cast %73 : vector<1x1xf32> to vector<1x1x1xf32>
    %cst_58 = arith.constant 4.8828125E-4 : f32
    %75 = vector.broadcast %cst_58 : f32 to vector<1x1x1xf32>
    %76 = arith.mulf %74, %75 : vector<1x1x1xf32>
    %77 = arith.mulf %70, %70 : vector<1x16x128xf32>
    %cst_59 = arith.constant dense<0.000000e+00> : vector<1x16xf32>
    %78 = vector.multi_reduction <add>, %77, %cst_59 [2] : vector<1x16x128xf32> to vector<1x16xf32>
    %79 = vector.shape_cast %78 : vector<1x16xf32> to vector<1x16x1xf32>
    %cst_60 = arith.constant dense<0.000000e+00> : vector<1x1xf32>
    %80 = vector.multi_reduction <add>, %79, %cst_60 [1] : vector<1x16x1xf32> to vector<1x1xf32>
    %81 = vector.shape_cast %80 : vector<1x1xf32> to vector<1x1x1xf32>
    %cst_61 = arith.constant 4.8828125E-4 : f32
    %82 = vector.broadcast %cst_61 : f32 to vector<1x1x1xf32>
    %83 = arith.mulf %81, %82 : vector<1x1x1xf32>
    %84 = arith.mulf %76, %76 : vector<1x1x1xf32>
    %85 = arith.subf %83, %84 : vector<1x1x1xf32>
    %86 = vector.broadcast %76 : vector<1x1x1xf32> to vector<1x16x128xf32>
    %87 = arith.subf %70, %86 : vector<1x16x128xf32>
    %cst_62 = arith.constant 0.000000e+00 : f32
    %88 = vector.broadcast %cst_62 : f32 to vector<1x1x1xf32>
    %89 = arith.maximumf %85, %88 : vector<1x1x1xf32>
    %cst_63 = arith.constant 9.99999974E-6 : f32
    %90 = vector.broadcast %cst_63 : f32 to vector<1x1x1xf32>
    %91 = arith.addf %89, %90 : vector<1x1x1xf32>
    %92 = math.rsqrt %91 : vector<1x1x1xf32>
    %93 = vector.broadcast %92 : vector<1x1x1xf32> to vector<1x16x128xf32>
    %94 = arith.mulf %87, %93 : vector<1x16x128xf32>
    %c1_64 = arith.constant 1 : index
    %c0_65 = arith.constant 0 : index
    %95 = vector.load %arg7[%c1_64, %c0_65] : memref<3x128xf32, #tpu.memory_space<vmem>>, vector<1x128xf32>
    %96 = vector.shape_cast %95 : vector<1x128xf32> to vector<1x1x128xf32>
    %97 = vector.broadcast %96 : vector<1x1x128xf32> to vector<1x16x128xf32>
    %98 = arith.mulf %94, %97 : vector<1x16x128xf32>
    %c2_66 = arith.constant 2 : index
    %c0_67 = arith.constant 0 : index
    %99 = vector.load %arg7[%c2_66, %c0_67] : memref<3x128xf32, #tpu.memory_space<vmem>>, vector<1x128xf32>
    %100 = vector.shape_cast %99 : vector<1x128xf32> to vector<1x1x128xf32>
    %101 = vector.broadcast %100 : vector<1x1x128xf32> to vector<1x16x128xf32>
    %102 = arith.addf %98, %101 : vector<1x16x128xf32>
    %c0_68 = arith.constant 0 : index
    %c1_69 = arith.constant 1 : index
    %c0_70 = arith.constant 0 : index
    %103 = vector.load %arg10[%c0_68, %c1_69, %c0_70] : memref<1x18x128xf32, #tpu.memory_space<vmem>>, vector<1x16x128xf32>
    tpu.vector_store %arg10[%c0_68, %c1_69, %c0_70], %102 {strides = array<i32>} : memref<1x18x128xf32, #tpu.memory_space<vmem>>, vector<1x16x128xf32>,
    %c0_71 = arith.constant 0 : index
    %c0_72 = arith.constant 0 : index
    %c0_73 = arith.constant 0 : index
    %104 = tpu.strided_load %arg10[%c0_71, %c0_72, %c0_73] {strides = array<i32: 1, 2, 1>} : memref<1x18x128xf32, #tpu.memory_space<vmem>>, vector<1x8x128xf32>
    %c0_74 = arith.constant 0 : index
    %c1_75 = arith.constant 1 : index
    %c0_76 = arith.constant 0 : index
    %105 = tpu.strided_load %arg10[%c0_74, %c1_75, %c0_76] {strides = array<i32: 1, 2, 1>} : memref<1x18x128xf32, #tpu.memory_space<vmem>>, vector<1x8x128xf32>
    %c0_77 = arith.constant 0 : index
    %c2_78 = arith.constant 2 : index
    %c0_79 = arith.constant 0 : index
    %106 = tpu.strided_load %arg10[%c0_77, %c2_78, %c0_79] {strides = array<i32: 1, 2, 1>} : memref<1x18x128xf32, #tpu.memory_space<vmem>>, vector<1x8x128xf32>
    %c0_80 = arith.constant 0 : index
    %c3 = arith.constant 3 : index
    %c0_81 = arith.constant 0 : index
    %107 = tpu.strided_load %arg10[%c0_80, %c3, %c0_81] {strides = array<i32: 1, 2, 1>} : memref<1x18x128xf32, #tpu.memory_space<vmem>>, vector<1x8x128xf32>
    %108 = tpu.concatenate %104, %105, %106, %107 in 2 : vector<1x8x128xf32>, vector<1x8x128xf32>, vector<1x8x128xf32>, vector<1x8x128xf32> -> vector<1x8x512xf32>
    %109 = vector.shape_cast %108 : vector<1x8x512xf32> to vector<8x512xf32>
    %110 = arith.truncf %109 : vector<8x512xf32> to vector<8x512xbf16>
    %c0_82 = arith.constant 0 : index
    %c0_83 = arith.constant 0 : index
    %111 = vector.load %arg5[%c0_82, %c0_83] : memref<512x64xbf16, #tpu.memory_space<vmem>>, vector<512x64xbf16>
    %cst_84 = arith.constant dense<0.000000e+00> : vector<8x64xf32>
    %112 = tpu.matmul %110, %111, %cst_84 {dimension_numbers = #tpu.dot_dimension_numbers<[1], [0], [0], [1], [0, 0, 1, 1], [], []>} : vector<8x512xbf16>, vector<512x64xbf16>, vector<8x64xf32> -> vector<8x64xf32>
    %113 = vector.shape_cast %112 : vector<8x64xf32> to vector<1x8x64xf32>
    %c0_85 = arith.constant 0 : index
    %c0_86 = arith.constant 0 : index
    %114 = vector.load %arg8[%c0_85, %c0_86] : memref<1x64xf32, #tpu.memory_space<vmem>>, vector<1x64xf32>
    %115 = vector.shape_cast %114 : vector<1x64xf32> to vector<1x1x64xf32>
    %116 = vector.broadcast %115 : vector<1x1x64xf32> to vector<1x8x64xf32>
    %117 = arith.addf %113, %116 : vector<1x8x64xf32>
    %c0_87 = arith.constant 0 : index
    %c0_88 = arith.constant 0 : index
    %c0_89 = arith.constant 0 : index
    %118 = vector.load %arg9[%c0_87, %c0_88, %c0_89] : memref<1x8x64xf32, #tpu.memory_space<vmem>>, vector<1x8x64xf32>
    tpu.vector_store %arg9[%c0_87, %c0_88, %c0_89], %117 {strides = array<i32>} : memref<1x8x64xf32, #tpu.memory_space<vmem>>, vector<1x8x64xf32>,
    return
  }
  func.func @transform_0(%arg0: i32) -> (i32, i32, i32) {
    %c0_i32 = arith.constant 0 : i32
    %c0_i32_0 = arith.constant 0 : i32
    %c0_i32_1 = arith.constant 0 : i32
    return %arg0, %c0_i32, %c0_i32_0 : i32, i32, i32
  }
  func.func @transform_1(%arg0: i32) -> (i32, i32, i32) {
    %c0_i32 = arith.constant 0 : i32
    %c0_i32_0 = arith.constant 0 : i32
    %c0_i32_1 = arith.constant 0 : i32
    return %arg0, %c0_i32, %c0_i32_0 : i32, i32, i32
  }
  func.func @transform_2(%arg0: i32) -> (i32, i32) {
    %c0_i32 = arith.constant 0 : i32
    %c0_i32_0 = arith.constant 0 : i32
    %c0_i32_1 = arith.constant 0 : i32
    return %c0_i32, %c0_i32_0 : i32, i32
  }
  func.func @transform_3(%arg0: i32) -> (i32, i32) {
    %c0_i32 = arith.constant 0 : i32
    %c0_i32_0 = arith.constant 0 : i32
    %c0_i32_1 = arith.constant 0 : i32
    return %c0_i32, %c0_i32_0 : i32, i32
  }
  func.func @transform_4(%arg0: i32) -> (i32, i32) {
    %c0_i32 = arith.constant 0 : i32
    %c0_i32_0 = arith.constant 0 : i32
    %c0_i32_1 = arith.constant 0 : i32
    return %c0_i32, %c0_i32_0 : i32, i32
  }
  func.func @transform_5(%arg0: i32) -> (i32, i32) {
    %c0_i32 = arith.constant 0 : i32
    %c0_i32_0 = arith.constant 0 : i32
    %c0_i32_1 = arith.constant 0 : i32
    return %c0_i32, %c0_i32_0 : i32, i32
  }
  func.func @transform_6(%arg0: i32) -> (i32, i32) {
    %c0_i32 = arith.constant 0 : i32
    %c0_i32_0 = arith.constant 0 : i32
    %c0_i32_1 = arith.constant 0 : i32
    return %c0_i32, %c0_i32_0 : i32, i32
  }
  func.func @transform_7(%arg0: i32) -> (i32, i32) {
    %c0_i32 = arith.constant 0 : i32
    %c0_i32_0 = arith.constant 0 : i32
    %c0_i32_1 = arith.constant 0 : i32
    return %c0_i32, %c0_i32_0 : i32, i32
  }
  func.func @transform_8(%arg0: i32) -> (i32, i32, i32) {
    %c0_i32 = arith.constant 0 : i32
    %c0_i32_0 = arith.constant 0 : i32
    %c0_i32_1 = arith.constant 0 : i32
    return %arg0, %c0_i32, %c0_i32_0 : i32, i32, i32
  }
}

</mosaic_0001>

<bundles_post_ra>
// kernel: _lambda_.1
= control target key start
LH: loop header
LB: loop body
LE: loop exit
PB: predicated region body
PF: predicated region fallthrough
CT: control target
= control target key end

     0   :  { %13 = vsyncpa [#allocation4], 0  ;;  %s1742_s27 = smov 0   ;;  %s1994_s0 = inlined_call_operand.vmem [shape: f32[2,16,64], index: 0, kind: input, shape index: {}]   ;;  %s1995_s1 = inlined_call_operand.vmem [shape: f32[2,1,128], index: 1, kind: input, shape index: {}]   ;;  %s1996_s2 = inlined_call_operand.hbm [shape: bf16[192,128], index: 2, kind: input, shape index: {}]   ;;  %s1997_s3 = inlined_call_operand.vmem [shape: bf16[384,128], index: 3, kind: input, shape index: {}]   ;;  %s1998_s4 = inlined_call_operand.vmem [shape: bf16[512,64], index: 4, kind: input, shape index: {}]   ;;  %s1999_s5 = inlined_call_operand.vmem [shape: f32[3,128], index: 5, kind: input, shape index: {}]   ;;  %s2000_s6 = inlined_call_operand.vmem [shape: f32[3,128], index: 6, kind: input, shape index: {}]   ;;  %s2001_s7 = inlined_call_operand.vmem [shape: f32[1,64], index: 7, kind: input, shape index: {}]   ;;  %s2002_s8 = inlined_call_operand.vmem [shape: f32[2,8,64], index: 8, kind: output, shape index: {}]  }
   0x1 LB: > { %s239_s30 = sshll.u32 %s1996_s2, 4  ;;  %s1256_s9 = sadd.s32 4294967295, %s1690_s27   ;;  %s1690_s27 = sphi %s1742_s27, %s19_s27   ;;  %s240_s30 = int_to_ptr.hbm [resolvable:$true] %s239_s30 }
   0x2   : > { %p1258_p0 = scmp.ge.s32.totalorder %s1690_s27, 1  ;;  %p228_p1 = scmp.lt.s32.totalorder %s1690_s27, 3 }
   0x3   : > { %p1618_p2 = scmp.eq.s32.totalorder %s1256_s9, 0  ;;  %s1692_s10 = smov [#allocation3]  }
   0x4   : > { %p229_p3 = pnand %p1258_p0, %p228_p1  ;;  %s241_s11 = sshll.u32 %s1692_s10, 4  ;;  %s242_s11 = int_to_ptr.vmem [resolvable:$true] %s241_s11 }
   0x5   : > { %s1693_s12 = smov 64   ;;  %s1694_s13 = smov 4  }
   0x6   : > { %p1614_p4 = pneg %p229_p3  ;;  %286 = sbr.rel (%p229_p3) target bundleno = 942 (0x3ae), region = 52 }
   0x8   : > { %p1615_p5 = pnand %p1618_p2, %p1614_p4 }
   0xa   : > { %1617 = dma.hbm_to_vmem [thread:$0]  (!%p1615_p5), %s240_s30, 1536, %s242_s11, [#allocation4], %s1693_s12, %s1693_s12, %s1694_s13  }
   0xb   : > { %1685 = dma.done.wait (%p1618_p2), [#allocation4], 1536  }
   0xc   : > { %1687 = vsyncadd (%p1618_p2), [#allocation4], 4294965760  ;;  %p323_p6 = scmp.lt.s32.totalorder %s1256_s9, 1  ;;  %v1695_v0 = vmov 0.0   ;;  %vm340_vm0 = vcmask 523264   ;;  %v1549_v3 = vld [vmem:[#allocation3 + $0x38] sm:$0xff] }
   0xd   : > { %337 = vst [vmem:[#allocation2 + $0x11] sm:$0x1] %v1695_v0  ;;  %v1553_v4 = vld [vmem:[#allocation3 + $0x58] sm:$0xff]  ;;  %460 = vmatpush.bf16.msra.mxu0 %v1549_v3  ;;  %v1548_v5 = vld [vmem:[#allocation3 + $0x30] sm:$0xff]  ;;  %v1547_v7 = vld [vmem:[#allocation3 + $0x28] sm:$0xff]  ;;  %s1696_s18 = smov 64  }
   0xe   : > { %s2004_s9 = smov (!%p323_p6, %s1256_s9), 1  ;;  %336 = vst [vmem:[#allocation2] sm:$0x1] %v1695_v0  ;;  %478 = vmatpush.bf16.msra.mxu1 %v1553_v4  ;;  %v1552_v6 = vld [vmem:[#allocation3 + $0x50] sm:$0xff]  ;;  %v1551_v8 = vld [vmem:[#allocation3 + $0x48] sm:$0xff]  ;;  %v1546_v12 = vld [vmem:[#allocation3 + $0x20] sm:$0xff] }
   0xf   : > { %s1541_s14 = sshll.u32 %s2004_s9, 4  ;;  %v1550_v13 = vld [vmem:[#allocation3 + $0x40] sm:$0xff]  ;;  %v1545_v16 = vld [vmem:[#allocation3 + $0x18] sm:$0xff]  ;;  %v1544_v18 = vld [vmem:[#allocation3 + $0x10] sm:$0xff]  ;;  %s330_s23 = scalar_lea.vmem %s1995_s1, %s2004_s9 }
  0x10   : > { %s327_s17 = scalar_lea.vmem %s1994_s0, %s1541_s14  ;;  %v1543_v19 = vld [vmem:[#allocation3 + $0x8] sm:$0xff]  ;;  %v1542_v20 = vld [vmem:[#allocation3] sm:$0xff]  ;;  %v1568_v43 = vld [vmem:[%s1997_s3 + $0x70] sm:$0xff]  ;;  %s1265_s10 = sshll.u32 %s2004_s9, 3 }
  0x11   : > { %v338_v1 = vld [vmem:[%s327_s17] sm:$0xff]  ;;  %v339_v2 = vld [vmem:[%s327_s17 + $0x8] sm:$0xff]  ;;  %461 = vmatpush.bf16.msra.mxu0 %v1548_v5  ;;  %v1569_v42 = vld [vmem:[%s1997_s3 + $0x78] sm:$0xff]  ;;  %s334_s15 = scalar_lea.vmem %s2002_s8, %s1265_s10 }
  0x12   : > { %341 = vst.msk [vmem:[#allocation2 + $0x1] sm:$0xff] %vm340_vm0, %v338_v1  ;;  %479 = vmatpush.bf16.msra.mxu1 %v1552_v6  ;;  %v1638_v30 = vld [vmem:[%s1999_s5] ss:$0 sm:$0xff]  ;;  %769 = vmatpush.bf16.msra.mxu3 %v1569_v42  ;;  %v1561_v48 = vld [vmem:[%s1997_s3 + $0x38] sm:$0xff]  ;;  %v1567_v50 = vld [vmem:[%s1997_s3 + $0x68] sm:$0xff] }
  0x13   : > { %342 = vst.msk [vmem:[#allocation2 + $0x9] sm:$0xff] %vm340_vm0, %v339_v2  ;;  %v1577_v49 = vld [vmem:[%s1997_s3 + $0xb8] sm:$0xff]  ;;  %755 = vmatpush.bf16.msra.mxu2 %v1561_v48  ;;  %v1560_v53 = vld [vmem:[%s1997_s3 + $0x30] sm:$0xff]  ;;  %v1566_v55 = vld [vmem:[%s1997_s3 + $0x60] sm:$0xff] }
  0x14   : > { %v1576_v54 = vld [vmem:[%s1997_s3 + $0xb0] sm:$0xff]  ;;  %v1559_v62 = vld [vmem:[%s1997_s3 + $0x28] sm:$0xff]  ;;  %v1565_v0 = vld [vmem:[%s1997_s3 + $0x58] sm:$0xff] }
  0x15   : > { %462 = vmatpush.bf16.msra.mxu0 %v1547_v7  ;;  %v1575_v63 = vld [vmem:[%s1997_s3 + $0xa8] sm:$0xff]  ;;  %v1558_v4 = vld [vmem:[%s1997_s3 + $0x20] sm:$0xff]  ;;  %v1564_v6 = vld [vmem:[%s1997_s3 + $0x50] sm:$0xff] }
  0x16   : > { %480 = vmatpush.bf16.msra.mxu1 %v1551_v8  ;;  %770 = vmatpush.bf16.msra.mxu3 %v1568_v43  ;;  %v1574_v5 = vld [vmem:[%s1997_s3 + $0xa0] sm:$0xff] }
  0x17   : > { %756 = vmatpush.bf16.msra.mxu2 %v1560_v53 }
  0x19   : > { %v345_v9 = vld [vmem:[#allocation2 + $0x1] sm:$0xff]  ;;  %463 = vmatpush.bf16.msra.mxu0 %v1546_v12 }
  0x1a   : > { %v346_v10 = vld [vmem:[#allocation2 + $0x9] sm:$0xff]  ;;  %481 = vmatpush.bf16.msra.mxu1 %v1550_v13  ;;  %v343_v22 = vld [vmem:[#allocation2] sm:$0xff]  ;;  %771 = vmatpush.bf16.msra.mxu3 %v1567_v50 }
  0x1b   : > { %v1633_v11 = vpack.i.bf16 %v346_v10, %v345_v9  ;;  %v347_v14 = vld [vmem:[#allocation2 + $0x2] sm:$0xff]  ;;  %v348_v15 = vld [vmem:[#allocation2 + $0xa] sm:$0xff]  ;;  %757 = vmatpush.bf16.msra.mxu2 %v1559_v62  ;;  %v1557_v10 = vld [vmem:[%s1997_s3 + $0x18] sm:$0xff] }
  0x1c   : > { %v360_v17 = vpack.c.bf16 %v348_v15, %v347_v14  ;;  %v344_v23 = vld [vmem:[#allocation2 + $0x8] sm:$0xff] }
  0x1d   : > { %1634 = vrot.lane.b32.xlu0 %v1633_v11, %s1696_s18  ;;  %464 = vmatpush.bf16.msra.mxu0 %v1545_v16  ;;  %v1573_v11 = vld [vmem:[%s1997_s3 + $0x98] sm:$0xff]  ;;  %v1563_v12 = vld [vmem:[%s1997_s3 + $0x48] sm:$0xff]  ;;  %v1556_v16 = vld [vmem:[%s1997_s3 + $0x10] sm:$0xff] }
  0x1e   : > { %1314 = vmatmul.msk.bf16.vlgmr.msra.gmra.mxu1 %vm340_vm0, %v360_v17  ;;  %772 = vmatpush.bf16.msra.mxu3 %v1566_v55  ;;  %v1572_v17 = vld [vmem:[%s1997_s3 + $0x90] sm:$0xff] }
  0x1f   : > { %783 = vmatpush.bf16.msrb.mxu1 %v1577_v49  ;;  %758 = vmatpush.bf16.msra.mxu2 %v1558_v4 }
  0x21   : > { %465 = vmatpush.bf16.msra.mxu0 %v1544_v18  ;;  %v1562_v18 = vld [vmem:[%s1997_s3 + $0x40] sm:$0xff] }
  0x22   : > { %773 = vmatpush.bf16.msra.mxu3 %v1565_v0 }
  0x23   : > { %784 = vmatpush.bf16.msrb.mxu1 %v1576_v54  ;;  %759 = vmatpush.bf16.msra.mxu2 %v1557_v10  ;;  %v1593_v10 = vld [vmem:[%s1998_s4 + $0x78] sm:$0xff] }
  0x25   : > { %466 = vmatpush.bf16.msra.mxu0 %v1543_v19 }
  0x26   : > { %774 = vmatpush.bf16.msra.mxu3 %v1564_v6 }
  0x27   : > { %785 = vmatpush.bf16.msrb.mxu1 %v1575_v63  ;;  %760 = vmatpush.bf16.msra.mxu2 %v1556_v16  ;;  %v1592_v16 = vld [vmem:[%s1998_s4 + $0x70] sm:$0xff] }
  0x29   : > { %467 = vmatpush.bf16.msra.mxu0 %v1542_v20  ;;  %v1555_v20 = vld [vmem:[%s1997_s3 + $0x8] sm:$0xff] }
  0x2a   : > { %775 = vmatpush.bf16.msra.mxu3 %v1563_v12  ;;  %v1609_v12 = vld [vmem:[%s1998_s4 + $0xf8] sm:$0xff] }
  0x2b   : > { %786 = vmatpush.bf16.msrb.mxu1 %v1574_v5  ;;  %761 = vmatpush.bf16.msra.mxu2 %v1555_v20 }
  0x2e   : > { %776 = vmatpush.bf16.msra.mxu3 %v1562_v18  ;;  %v1608_v18 = vld [vmem:[%s1998_s4 + $0xf0] sm:$0xff] }
  0x2f   : > { %787 = vmatpush.bf16.msrb.mxu1 %v1573_v11  ;;  %v1601_v11 = vld [vmem:[%s1998_s4 + $0xb8] sm:$0xff] }
  0x32   : > { %1150 = vmatpush.bf16.msrb.mxu3 %v1601_v11 }
  0x33   : > { %788 = vmatpush.bf16.msrb.mxu1 %v1572_v17  ;;  %v1600_v17 = vld [vmem:[%s1998_s4 + $0xb0] sm:$0xff] }
  0x36   : > { %1151 = vmatpush.bf16.msrb.mxu3 %v1600_v17 }
  0x8f   : > { %v1635_v21 = vpop.permute.xlu0 %1634 }
  0x90   : > { %v1637_v24 = vunpack.i.h.bf16 %v1635_v21  ;;  %v1636_v25 = vunpack.i.l.bf16 %v1635_v21  ;;  %v1571_v21 = vld [vmem:[%s1997_s3 + $0x88] sm:$0xff] }
  0x91   : > { %789 = vmatpush.bf16.msrb.mxu1 %v1571_v21 }
  0x92   : > { %v357_v26 = vsel %vm340_vm0, %v343_v22, %v1636_v25  ;;  %v358_v27 = vsel %vm340_vm0, %v344_v23, %v1637_v24  ;;  %v1554_v24 = vld [vmem:[%s1997_s3] sm:$0xff] }
  0x93   : > { %v359_v28 = vpack.c.bf16 %v358_v27, %v357_v26  ;;  %v1570_v25 = vld [vmem:[%s1997_s3 + $0x80] sm:$0xff]  ;;  %762 = vmatpush.bf16.msra.mxu2 %v1554_v24  ;;  %v1583_v24 = vld [vmem:[%s1998_s4 + $0x28] sm:$0xff] }
  0x95   : > { %468 = vmatmul.bf16.vlgmr.msra.gmra.mxu0 %v359_v28  ;;  %790 = vmatpush.bf16.msrb.mxu1 %v1570_v25  ;;  %v1591_v25 = vld [vmem:[%s1998_s4 + $0x68] sm:$0xff] }
  0x97   : > { %1137 = vmatpush.bf16.msrb.mxu2 %v1593_v10  ;;  %v1644_v10 = vld [vmem:[%s2000_s6 + $0x2] ss:$0 sm:$0xff] }
  0x99   : > { %1163 = vmatpush.bf16.msra.mxu1 %v1609_v12 }
  0x9b   : > { %v483_v29 = vpop.f32.mrf.mxu1  ;;  %1138 = vmatpush.bf16.msrb.mxu2 %v1592_v16 }
  0x9d   : > { %1164 = vmatpush.bf16.msra.mxu1 %v1608_v18 }
  0x9f   : > { %1139 = vmatpush.bf16.msrb.mxu2 %v1591_v25 }
  0xa3   : > { %v485_v35 = vpop.f32.mrf.mxu1 }
 0x112   : > { %v469_v31 = vpop.f32.mrf.mxu0 }
 0x113   : > { %v484_v32 = vadd.f32 %v483_v29, %v469_v31 }
 0x115   : > { %v490_v33 = vadd.f32 %v1638_v30, %v484_v32 }
 0x117   : > { %v1767_v34 = vmax.f32 %v490_v33, 0.0 }
 0x119   : > { %494 = vadd.xlane.f32.xlu0 %v1767_v34  ;;  %v506_v41 = vmul.f32 %v1767_v34, %v1767_v34 }
 0x11a   : > { %v471_v36 = vpop.f32.mrf.mxu0 }
 0x11b   : > { %v486_v37 = vadd.f32 %v485_v35, %v471_v36  ;;  %v1639_v35 = vld [vmem:[%s1999_s5 + $0x1] ss:$0 sm:$0xff] }
 0x11d   : > { %v491_v38 = vadd.f32 %v1638_v30, %v486_v37  ;;  %v1640_v37 = vld [vmem:[%s1999_s5 + $0x2] ss:$0 sm:$0xff] }
 0x11f   : > { %v1770_v39 = vmax.f32 %v491_v38, 0.0 }
 0x121   : > { %496 = vadd.xlane.f32.xlu1 %v1770_v39  ;;  %v507_v40 = vmul.f32 %v1770_v39, %v1770_v39 }
 0x123   : > { %510 = vadd.xlane.f32.xlu2 %v507_v40 }
 0x129   : > { %508 = vadd.xlane.f32.xlu1 %v506_v41  ;;  %v1641_v41 = vld [vmem:[%s330_s23] ss:$0 sm:$0xff] }
 0x18c   : > { %v495_v44 = vpop.xlane.xlu0 %494 }
 0x194   : > { %v497_v45 = vpop.xlane.xlu1 %496 }
 0x195   : > { %v498_v46 = vadd.f32 %v497_v45, %v495_v44 }
 0x196   : > { %v511_v56 = vpop.xlane.xlu2 %510 }
 0x197   : > { %v499_v47 = vrot.slane %v498_v46, 4 }
 0x199   : > { %v500_v51 = vadd.f32 %v499_v47, %v498_v46 }
 0x19b   : > { %v501_v52 = vrot.slane %v500_v51, 2 }
 0x19c   : > { %v509_v57 = vpop.xlane.xlu1 %508 }
 0x19d   : > { %v502_v58 = vadd.f32 %v501_v52, %v500_v51  ;;  %v512_v59 = vadd.f32 %v511_v56, %v509_v57  ;;  %v1642_v57 = vld [vmem:[%s2000_s6] ss:$0 sm:$0xff] }
 0x19f   : > { %v503_v60 = vrot.slane %v502_v58, 1  ;;  %v513_v61 = vrot.slane %v512_v59, 4 }
 0x1a1   : > { %v514_v1 = vadd.f32 %v513_v61, %v512_v59  ;;  %v504_v2 = vadd.f32 %v503_v60, %v502_v58 }
 0x1a3   : > { %v515_v3 = vrot.slane %v514_v1, 2  ;;  %v505_v8 = vmul.f32 0.00048828125, %v504_v2 }
 0x1a5   : > { %v516_v7 = vadd.f32 %v515_v3, %v514_v1  ;;  %v520_v14 = vmul.f32 %v505_v8, %v505_v8  ;;  %v522_v32 = vsub.f32 %v1767_v34, %v505_v8  ;;  %v523_v33 = vsub.f32 %v1770_v39, %v505_v8 }
 0x1a7   : > { %v517_v9 = vrot.slane %v516_v7, 1 }
 0x1a9   : > { %v518_v13 = vadd.f32 %v517_v9, %v516_v7  ;;  %v1585_v9 = vld [vmem:[%s1998_s4 + $0x38] sm:$0xff] }
 0x1aa   : > { %1124 = vmatpush.bf16.msrb.mxu0 %v1585_v9 }
 0x1ab   : > { %v519_v15 = vmul.f32 0.00048828125, %v518_v13 }
 0x1ad   : > { %v521_v19 = vsub.f32 %v519_v15, %v520_v14  ;;  %v1584_v15 = vld [vmem:[%s1998_s4 + $0x30] sm:$0xff] }
 0x1ae   : > { %1125 = vmatpush.bf16.msrb.mxu0 %v1584_v15 }
 0x1af   : > { %v524_v22 = vmax.f32 %v521_v19, 0.0 }
 0x1b1   : > { %v525_v23 = vadd.f32 1e-05, %v524_v22 }
 0x1b2   : > { %1126 = vmatpush.bf16.msrb.mxu0 %v1583_v24 }
 0x1b3   : > { %1646 = vrsqrt.f32 %v525_v23  ;;  %vm532_vm2 = vweird.f32 %v525_v23 }
 0x1b9   : > { %v1647_v26 = vpop.eup %1646 }
 0x1ba   : > { %v527_v27 = vmul.f32 %v1647_v26, %v525_v23  ;;  %vm533_vm1 = vweird.f32 %v1647_v26 }
 0x1bb   : > { %vm534_vm3 = vmor %vm532_vm2, %vm533_vm1 }
 0x1bc   : > { %v528_v28 = vmul.f32 %v1647_v26, %v527_v27  ;;  %v1607_v27 = vld [vmem:[%s1998_s4 + $0xe8] sm:$0xff] }
 0x1bd   : > { %1165 = vmatpush.bf16.msra.mxu1 %v1607_v27 }
 0x1be   : > { %v529_v29 = vmul.f32 0.5, %v528_v28 }
 0x1c0   : > { %v530_v30 = vsub.f32 1.5, %v529_v29 }
 0x1c2   : > { %v531_v31 = vmul.f32 %v1647_v26, %v530_v30 }
 0x1c4   : > { %v535_v36 = vsel %vm534_vm3, %v1647_v26, %v531_v31  ;;  %v1599_v26 = vld [vmem:[%s1998_s4 + $0xa8] sm:$0xff]  ;;  %v1582_v31 = vld [vmem:[%s1998_s4 + $0x20] sm:$0xff] }
 0x1c5   : > { %v536_v38 = vmul.f32 %v535_v36, %v522_v32  ;;  %v537_v40 = vmul.f32 %v535_v36, %v523_v33  ;;  %1152 = vmatpush.bf16.msrb.mxu3 %v1599_v26  ;;  %v1590_v32 = vld [vmem:[%s1998_s4 + $0x60] sm:$0xff]  ;;  %1127 = vmatpush.bf16.msrb.mxu0 %v1582_v31 }
 0x1c6   : > { %v1598_v33 = vld [vmem:[%s1998_s4 + $0xa0] sm:$0xff]  ;;  %1140 = vmatpush.bf16.msrb.mxu2 %v1590_v32 }
 0x1c7   : > { %v540_v34 = vmul.f32 %v1639_v35, %v536_v38  ;;  %v541_v42 = vmul.f32 %v1639_v35, %v537_v40  ;;  %v1606_v35 = vld [vmem:[%s1998_s4 + $0xe0] sm:$0xff]  ;;  %v1581_v40 = vld [vmem:[%s1998_s4 + $0x18] sm:$0xff] }
 0x1c8   : > { %1166 = vmatpush.bf16.msra.mxu1 %v1606_v35 }
 0x1c9   : > { %v544_v39 = vadd.f32 %v1640_v37, %v540_v34  ;;  %v545_v43 = vadd.f32 %v1640_v37, %v541_v42  ;;  %1153 = vmatpush.bf16.msrb.mxu3 %v1598_v33  ;;  %v1597_v34 = vld [vmem:[%s1998_s4 + $0x98] sm:$0xff]  ;;  %1128 = vmatpush.bf16.msrb.mxu0 %v1581_v40 }
 0x1ca   : > { %v1605_v42 = vld [vmem:[%s1998_s4 + $0xd8] sm:$0xff] }
 0x1cb   : > { %v550_v44 = vadd.f32 %v1641_v41, %v544_v39  ;;  %v551_v45 = vadd.f32 %v1641_v41, %v545_v43  ;;  %v1589_v41 = vld [vmem:[%s1998_s4 + $0x58] sm:$0xff] }
 0x1cc   : > { %1141 = vmatpush.bf16.msrb.mxu2 %v1589_v41  ;;  %1167 = vmatpush.bf16.msra.mxu1 %v1605_v42 }
 0x1cd   : > { %552 = vst [vmem:[#allocation2 + $0x1] sm:$0xff] %v550_v44  ;;  %v561_v46 = vpack.c.bf16 %v551_v45, %v550_v44  ;;  %1154 = vmatpush.bf16.msrb.mxu3 %v1597_v34 }
 0x1ce   : > { %553 = vst [vmem:[#allocation2 + $0x9] sm:$0xff] %v551_v45  ;;  %v1580_v45 = vld [vmem:[%s1998_s4 + $0x10] sm:$0xff] }
 0x1cf   : > { %777 = vmatmul.bf16.vlgmr.msra.gmra.mxu3 %v561_v46  ;;  %v1588_v46 = vld [vmem:[%s1998_s4 + $0x50] sm:$0xff]  ;;  %1129 = vmatpush.bf16.msrb.mxu0 %v1580_v45 }
 0x1d0   : > { %1142 = vmatpush.bf16.msrb.mxu2 %v1588_v46 }
 0x1d4   : > { %v554_v47 = vld [vmem:[#allocation2] sm:$0xff] }
 0x1d5   : > { %v555_v48 = vld [vmem:[#allocation2 + $0x8] sm:$0xff] }
 0x1d6   : > { %v558_v49 = vld [vmem:[#allocation2 + $0x2] sm:$0xff]  ;;  %v559_v50 = vld [vmem:[#allocation2 + $0xa] sm:$0xff]  ;;  %v560_v51 = vpack.c.bf16 %v555_v48, %v554_v47 }
 0x1d7   : > { %v562_v52 = vpack.c.bf16 %v559_v50, %v558_v49  ;;  %v1596_v47 = vld [vmem:[%s1998_s4 + $0x90] sm:$0xff] }
 0x1d8   : > { %763 = vmatmul.bf16.vlgmr.msra.gmra.mxu2 %v560_v51  ;;  %v1604_v48 = vld [vmem:[%s1998_s4 + $0xd0] sm:$0xff]  ;;  %1155 = vmatpush.bf16.msrb.mxu3 %v1596_v47  ;;  %v1579_v51 = vld [vmem:[%s1998_s4 + $0x8] sm:$0xff] }
 0x1d9   : > { %791 = vmatmul.bf16.vlgmr.msrb.gmra.mxu1 %v562_v52  ;;  %v1587_v52 = vld [vmem:[%s1998_s4 + $0x48] sm:$0xff]  ;;  %1130 = vmatpush.bf16.msrb.mxu0 %v1579_v51 }
 0x1da   : > { %1168 = vmatpush.bf16.msra.mxu1 %v1604_v48  ;;  %1143 = vmatpush.bf16.msrb.mxu2 %v1587_v52 }
 0x252   : > { %v778_v53 = vpop.f32.mrf.mxu3 }
 0x256   : > { %v792_v54 = vpop.f32.mrf.mxu1 }
 0x25a   : > { %v780_v62 = vpop.f32.mrf.mxu3 }
 0x25b   : > { %v764_v55 = vpop.f32.mrf.mxu2 }
 0x25c   : > { %v779_v56 = vadd.f32 %v778_v53, %v764_v55  ;;  %v1595_v53 = vld [vmem:[%s1998_s4 + $0x88] sm:$0xff] }
 0x25d   : > { %v1603_v55 = vld [vmem:[%s1998_s4 + $0xc8] sm:$0xff]  ;;  %1156 = vmatpush.bf16.msrb.mxu3 %v1595_v53 }
 0x25e   : > { %v793_v58 = vadd.f32 %v792_v54, %v779_v56  ;;  %v794_v0 = vpop.f32.mrf.mxu1  ;;  %1169 = vmatpush.bf16.msra.mxu1 %v1603_v55 }
 0x260   : > { %v799_v59 = vadd.f32 %v1642_v57, %v793_v58  ;;  %v1586_v58 = vld [vmem:[%s1998_s4 + $0x40] sm:$0xff] }
 0x261   : > { %1144 = vmatpush.bf16.msrb.mxu2 %v1586_v58 }
 0x262   : > { %v1869_v60 = vmax.f32 %v799_v59, 0.0  ;;  %v1594_v59 = vld [vmem:[%s1998_s4 + $0x80] sm:$0xff] }
 0x263   : > { %v766_v61 = vpop.f32.mrf.mxu2  ;;  %1157 = vmatpush.bf16.msrb.mxu3 %v1594_v59 }
 0x264   : > { %v781_v63 = vadd.f32 %v780_v62, %v766_v61  ;;  %803 = vadd.xlane.f32.xlu2 %v1869_v60  ;;  %v815_v3 = vmul.f32 %v1869_v60, %v1869_v60  ;;  %v1602_v61 = vld [vmem:[%s1998_s4 + $0xc0] sm:$0xff] }
 0x265   : > { %1170 = vmatpush.bf16.msra.mxu1 %v1602_v61 }
 0x266   : > { %v795_v1 = vadd.f32 %v794_v0, %v781_v63 }
 0x268   : > { %v800_v2 = vadd.f32 %v1642_v57, %v795_v1  ;;  %v1578_v57 = vld [vmem:[%s1998_s4] sm:$0xff] }
 0x269   : > { %1131 = vmatpush.bf16.msrb.mxu0 %v1578_v57 }
 0x26a   : > { %v1874_v4 = vmax.f32 %v800_v2, 0.0 }
 0x26c   : > { %817 = vadd.xlane.f32.xlu2 %v815_v3  ;;  %805 = vadd.xlane.f32.xlu1 %v1874_v4  ;;  %v816_v5 = vmul.f32 %v1874_v4, %v1874_v4 }
 0x274   : > { %819 = vadd.xlane.f32.xlu1 %v816_v5 }
 0x2d7   : > { %v804_v6 = vpop.xlane.xlu2 %803 }
 0x2df   : > { %v806_v7 = vpop.xlane.xlu1 %805  ;;  %v818_v20 = vpop.xlane.xlu2 %817 }
 0x2e0   : > { %v807_v8 = vadd.f32 %v806_v7, %v804_v6 }
 0x2e2   : > { %v808_v13 = vrot.slane %v807_v8, 4 }
 0x2e4   : > { %v809_v14 = vadd.f32 %v808_v13, %v807_v8  ;;  %v1643_v8 = vld [vmem:[%s2000_s6 + $0x1] ss:$0 sm:$0xff] }
 0x2e6   : > { %v810_v19 = vrot.slane %v809_v14, 2 }
 0x2e7   : > { %v820_v21 = vpop.xlane.xlu1 %819 }
 0x2e8   : > { %v811_v22 = vadd.f32 %v810_v19, %v809_v14  ;;  %v821_v23 = vadd.f32 %v820_v21, %v818_v20 }
 0x2ea   : > { %v812_v28 = vrot.slane %v811_v22, 1  ;;  %v822_v29 = vrot.slane %v821_v23, 4 }
 0x2ec   : > { %v823_v30 = vadd.f32 %v822_v29, %v821_v23  ;;  %v813_v36 = vadd.f32 %v812_v28, %v811_v22 }
 0x2ee   : > { %v824_v37 = vrot.slane %v823_v30, 2  ;;  %v814_v39 = vmul.f32 0.00048828125, %v813_v36 }
 0x2f0   : > { %v825_v38 = vadd.f32 %v824_v37, %v823_v30  ;;  %v829_v49 = vmul.f32 %v814_v39, %v814_v39  ;;  %v831_v6 = vsub.f32 %v1869_v60, %v814_v39  ;;  %v832_v7 = vsub.f32 %v1874_v4, %v814_v39  ;;  %v1645_v30 = vld [vmem:[%s2001_s7] ss:$0 sm:$0xff] }
 0x2f2   : > { %v826_v43 = vrot.slane %v825_v38, 1 }
 0x2f4   : > { %v827_v44 = vadd.f32 %v826_v43, %v825_v38 }
 0x2f6   : > { %v828_v50 = vmul.f32 0.00048828125, %v827_v44 }
 0x2f8   : > { %v830_v54 = vsub.f32 %v828_v50, %v829_v49 }
 0x2fa   : > { %v833_v56 = vmax.f32 %v830_v54, 0.0 }
 0x2fc   : > { %v834_v62 = vadd.f32 1e-05, %v833_v56 }
 0x2fe   : > { %1648 = vrsqrt.f32 %v834_v62  ;;  %vm841_vm5 = vweird.f32 %v834_v62 }
 0x304   : > { %v1649_v63 = vpop.eup %1648 }
 0x305   : > { %v836_v0 = vmul.f32 %v1649_v63, %v834_v62  ;;  %vm842_vm4 = vweird.f32 %v1649_v63 }
 0x306   : > { %vm843_vm6 = vmor %vm841_vm5, %vm842_vm4 }
 0x307   : > { %v837_v1 = vmul.f32 %v1649_v63, %v836_v0 }
 0x309   : > { %v838_v2 = vmul.f32 0.5, %v837_v1 }
 0x30b   : > { %v839_v3 = vsub.f32 1.5, %v838_v2 }
 0x30d   : > { %v840_v5 = vmul.f32 %v1649_v63, %v839_v3 }
 0x30f   : > { %v844_v9 = vsel %vm843_vm6, %v1649_v63, %v840_v5 }
 0x310   : > { %v845_v11 = vmul.f32 %v844_v9, %v831_v6  ;;  %v846_v12 = vmul.f32 %v844_v9, %v832_v7 }
 0x312   : > { %v849_v13 = vmul.f32 %v1643_v8, %v845_v11  ;;  %v850_v14 = vmul.f32 %v1643_v8, %v846_v12 }
 0x314   : > { %v853_v15 = vadd.f32 %v1644_v10, %v849_v13  ;;  %v854_v16 = vadd.f32 %v1644_v10, %v850_v14 }
 0x316   : > { %855 = vst [vmem:[#allocation2 + $0x1] sm:$0xff] %v853_v15 }
 0x317   : > { %856 = vst [vmem:[#allocation2 + $0x9] sm:$0xff] %v854_v16 }
 0x31e   : > { %v857_v60 = vld [vmem:[#allocation2] ss:$2 sm:$0xff]  ;;  %v859_v4 = vld [vmem:[#allocation2 + $0x1] ss:$2 sm:$0xff] }
 0x31f   : > { %v861_v17 = vld [vmem:[#allocation2 + $0x2] ss:$2 sm:$0xff]  ;;  %v864_v18 = vpack.c.bf16 %v857_v60, %v857_v60  ;;  %v865_v19 = vpack.c.bf16 %v859_v4, %v859_v4  ;;  %v863_v21 = vld [vmem:[#allocation2 + $0x3] ss:$2 sm:$0xff] }
 0x320   : > { %v866_v20 = vpack.c.bf16 %v861_v17, %v861_v17  ;;  %v867_v22 = vpack.c.bf16 %v863_v21, %v863_v21 }
 0x321   : > { %1132 = vmatmul.bf16.vlgmr.msrb.gmra.mxu0 %v864_v18  ;;  %1145 = vmatmul.bf16.vlgmr.msrb.gmra.mxu2 %v865_v19 }
 0x322   : > { %1158 = vmatmul.bf16.vlgmr.msrb.gmra.mxu3 %v866_v20  ;;  %1171 = vmatmul.bf16.vlgmr.msra.gmra.mxu1 %v867_v22 }
 0x39e   : > { %v1133_v23 = vpop.f32.mrf.mxu0 }
 0x39f   : > { %v1172_v24 = vpop.f32.mrf.mxu1 }
 0x3a4   : > { %v1146_v25 = vpop.f32.mrf.mxu2 }
 0x3a5   : > { %v1147_v26 = vadd.f32 %v1146_v25, %v1133_v23  ;;  %v1159_v27 = vpop.f32.mrf.mxu3 }
 0x3a6   : > { %v1135_v28 = vpop.f32.mrf.mxu0 }
 0x3a7   : > { %v1160_v29 = vadd.f32 %v1159_v27, %v1147_v26  ;;  %v1174_v31 = vpop.f32.mrf.mxu1 }
 0x3a9   : > { %v1173_v32 = vadd.f32 %v1172_v24, %v1160_v29 }
 0x3ab   : > { %v1180_v33 = vadd.f32 %v1645_v30, %v1173_v32 }
 0x3ac   : > { %v1148_v35 = vpop.f32.mrf.mxu2 }
 0x3ad   : > { %1181 = vst.msk [vmem:[%s334_s15] sm:$0xff] %vm340_vm0, %v1180_v33  ;;  %v1161_v36 = vpop.f32.mrf.mxu3 }
 0x3ae PF: > { %s19_s27 = sadd.s32 1, %s1690_s27  }
 0x3af   : > { %p16_p7 = scmp.ge.s32.totalorder %s19_s27, 4  }
 0x3b1   :  { %18 = sbr.rel (!%p16_p7) target bundleno = 1 (0x1), region = 93 }
 0x3b6   :  { %1201 = vsyncpa [#allocation4], 1 }
 0x3b7   :  { %1203 = vsyncpa [#allocation4 + $0x1], 1 }

</bundles_post_ra>
